<compile_context>
chip_gen: v7x
topology: tpu7x:2x2x1
jax: 0.10.0
libtpu: 0.0.40
codegen_flags: <defaults>
</compile_context>

<pallas_src>
import jax
import jax.numpy as jnp
from jax.experimental import pallas as pl
from jax.experimental.pallas import tpu as pltpu

_DEFAULT_TILE_B = 131072      # samples per grid step
_TILE_GRAIN = 2048            # 16 sublanes x 128 lanes: safe for f32 and bf16

# Packed-parameter layout inside the (49,) f32 SMEM operand.
_W1, _B1 = 0, 32              # w1: (4,8) row-major, b1: (4,)
_W2, _B2 = 36, 44             # w2: (2,4) row-major, b2: (2,)
_W3, _B3 = 46, 48             # w3: (1,2) row-major, b3: (1,)
_NPARAMS = 49


def _round_up(n, m):
    return ((n + m - 1) // m) * m


def _mlp_kernel(p_ref, x_ref, o_ref):
    """p_ref: SMEM (49,) f32 packed params.
    x_ref : VMEM (8, rows_tile, 128) block -- 8 dense feature planes.
    o_ref : VMEM (rows_tile, 128) block -- lane-dense output."""
    f32 = jnp.float32

    # ---- Layer 1: 8 -> 4.  Each feature plane is loaded, cast to f32 and
    # consumed immediately (no whole-tile f32 copy); SMEM scalar weights are
    # splatted into dense vector-scalar multiply/adds.
    z1 = [None, None, None, None]
    for k in range(8):
        xk = x_ref[k, :, :].astype(f32)
        for j in range(4):
            t = xk * p_ref[_W1 + j * 8 + k]
            z1[j] = t if z1[j] is None else z1[j] + t
    h1 = [jax.nn.sigmoid(z1[j] + p_ref[_B1 + j]) for j in range(4)]

    # ---- Layers 2 (4 -> 2) and 3 (2 -> 1): same dense scalar-weight form.
    def dense_layer(h_in, w_off, b_off, n_out, n_in):
        outs = []
        for j in range(n_out):
            acc = h_in[0] * p_ref[w_off + j * n_in]
            for k in range(1, n_in):
                acc = acc + h_in[k] * p_ref[w_off + j * n_in + k]
            outs.append(jax.nn.sigmoid(acc + p_ref[b_off + j]))
        return outs

    h2 = dense_layer(h1, _W2, _B2, 2, 4)
    h3 = dense_layer(h2, _W3, _B3, 1, 2)

    o_ref[...] = h3[0].astype(o_ref.dtype)


def _pack_params(params):
    return jnp.concatenate([
        params["w1"].reshape(-1), params["b1"].reshape(-1),
        params["w2"].reshape(-1), params["b2"].reshape(-1),
        params["w3"].reshape(-1), params["b3"].reshape(-1),
    ]).astype(jnp.float32)


def diabetes_forward(x, params, *, tile_b=None, feature_major=False):
    """Forward pass of DiabetesTrainModel.

    x: (B, 8) sample-major (PyTorch layout) or, with feature_major=True,
       (8, B) feature-major (the preferred zero-copy layout).  f32 or bf16;
       output dtype matches x.
    params: w1 (4,8), b1 (4,1), w2 (2,4), b2 (2,1), w3 (1,2), b3 (1,1)
            in PyTorch [out, in] layout, float32.
    returns: (B, 1) array.
    """
    if feature_major:
        assert x.ndim == 2 and x.shape[0] == 8, x.shape
        x_fm = x
        B = x.shape[1]
    else:
        assert x.ndim == 2 and x.shape[1] == 8, x.shape
        B = x.shape[0]
        # Compatibility path only: this transpose is one extra HBM pass over
        # x.  For peak throughput produce activations feature-major upstream.
        x_fm = jnp.transpose(x)
    out_dtype = x.dtype

    # (8, B) -> (8, B/128, 128) is a free contiguous reshape when B % 128 == 0
    # (the pad copy only happens for ragged batches).
    B128 = _round_up(B, 128)
    if B128 != B:
        x_fm = jnp.pad(x_fm, ((0, 0), (0, B128 - B)))
    rows = B128 // 128
    x3 = x_fm.reshape(8, rows, 128)

    if tile_b is None:
        # Large tiles amortize the ~0.35us/step overhead; cap at ~half the
        # batch so the grid has >= 2 steps (keeps both v7x TCs busy).
        tile_b = min(_DEFAULT_TILE_B,
                     max(_TILE_GRAIN, _round_up((B128 + 1) // 2, _TILE_GRAIN)))
    assert tile_b % _TILE_GRAIN == 0, "tile_b must be a multiple of 2048"
    rows_tile = min(tile_b // 128, rows)   # small batch: one full-array block
    grid = (pl.cdiv(rows, rows_tile),)

    p_flat = _pack_params(params)
    assert p_flat.shape == (_NPARAMS,)

    # Raise the scoped-VMEM limit only when an oversized tile needs it.
    x_bytes = jnp.dtype(x3.dtype).itemsize
    o_bytes = jnp.dtype(out_dtype).itemsize
    est = (2 * 8 * rows_tile * 128 * x_bytes       # double-buffered input tile
           + 2 * rows_tile * 128 * o_bytes         # double-buffered output tile
           + 12 * rows_tile * 128 * 4              # live f32 slabs in-kernel
           + (2 << 20))
    cp = dict(dimension_semantics=("parallel",))
    if est > (30 << 20):
        cp["vmem_limit_bytes"] = int(est * 1.25)

    out3 = pl.pallas_call(
        _mlp_kernel,
        out_shape=jax.ShapeDtypeStruct((rows, 128), out_dtype),
        grid=grid,
        in_specs=[
            pl.BlockSpec(memory_space=pltpu.MemorySpace.SMEM),       # 49 scalars
            pl.BlockSpec((8, rows_tile, 128), lambda i: (0, i, 0)),  # x planes
        ],
        out_specs=pl.BlockSpec((rows_tile, 128), lambda i: (i, 0)),
        compiler_params=pltpu.CompilerParams(**cp),
    )(p_flat, x3)

    # (rows, 128) -> (B, 1) via reshapes only (no transpose, no extra pass).
    return out3.reshape(B128)[:B].reshape(B, 1)


def init_params(key):
    """Deterministic PyTorch-style (uniform +-1/sqrt(fan_in)) init."""
    def linear(k, fan_in, fan_out):
        kw, kb = jax.random.split(k)
        bound = 1.0 / (fan_in ** 0.5)
        w = jax.random.uniform(kw, (fan_out, fan_in), jnp.float32, -bound, bound)
        b = jax.random.uniform(kb, (fan_out, 1), jnp.float32, -bound, bound)
        return w, b

    k1, k2, k3 = jax.random.split(key, 3)
    w1, b1 = linear(k1, 8, 4)
    w2, b2 = linear(k2, 4, 2)
    w3, b3 = linear(k3, 2, 1)
    return {"w1": w1, "b1": b1, "w2": w2, "b2": b2, "w3": w3, "b3": b3}


def _reference(x, p):
    """Pure-JAX reference (f32), x in (B, 8) sample-major layout."""
    h = jax.nn.sigmoid(x @ p["w1"].T + p["b1"][:, 0])
    h = jax.nn.sigmoid(h @ p["w2"].T + p["b2"][:, 0])
    return jax.nn.sigmoid(h @ p["w3"].T + p["b3"][:, 0])


if __name__ == "__main__":
    key = jax.random.PRNGKey(0)
    kp, k1, k2, k3 = jax.random.split(key, 4)
    params = init_params(kp)

    # 1) Fast path: feature-major (8, B), bf16 I/O, multi-step pipelined grid.
    B1 = 4096
    x1_f32 = jax.random.normal(k1, (8, B1), dtype=jnp.float32)
    out1 = jax.block_until_ready(
        diabetes_forward(x1_f32.astype(jnp.bfloat16), params,
                         tile_b=2048, feature_major=True))
    ref1 = _reference(jnp.transpose(x1_f32), params)
    assert out1.shape == (B1, 1) and out1.dtype == jnp.bfloat16
    assert jnp.allclose(out1.astype(jnp.float32), ref1, atol=2e-2, rtol=2e-2)

    # 2) PyTorch (B, 8) layout, f32, ragged batch (internally padded to 128).
    B2 = 300
    x2 = jax.random.normal(k2, (B2, 8), dtype=jnp.float32)
    out2 = jax.block_until_ready(diabetes_forward(x2, params))
    ref2 = _reference(x2, params)
    assert out2.shape == (B2, 1)
    assert jnp.allclose(out2, ref2, atol=1e-5, rtol=1e-5)

    # 3) Feature-major f32, default tile selection.
    B3 = 1024
    x3 = jax.random.normal(k3, (8, B3), dtype=jnp.float32)
    out3 = jax.block_until_ready(diabetes_forward(x3, params, feature_major=True))
    ref3 = _reference(jnp.transpose(x3), params)
    assert out3.shape == (B3, 1)
    assert jnp.allclose(out3, ref3, atol=1e-5, rtol=1e-5)

    print("KERNEL_OK")
</pallas_src>

<mosaic_0001>
module attributes {stable_mosaic.version = 11 : i64} {
  func.func @_mlp_kernel(%arg0: i32, %arg1: memref<49xf32, #tpu.memory_space<smem>>, %arg2: memref<8x16x128xbf16, #tpu.memory_space<vmem>>, %arg3: memref<16x128xbf16, #tpu.memory_space<vmem>>) attributes {dimension_semantics = [#tpu.dimension_semantics<parallel>], iteration_bounds = array<i64: 2>, scalar_prefetch = 0 : i64, scratch_operands = 0 : i64, tpu.core_type = #tpu.core_type<tc>, window_params = [{transform_indices = @transform_0, window_bounds = array<i64: 49>}, {transform_indices = @transform_1, window_bounds = array<i64: 8, 16, 128>}, {transform_indices = @transform_2, window_bounds = array<i64: 16, 128>}]} {
    %c0 = arith.constant 0 : index
    %c0_0 = arith.constant 0 : index
    %c0_1 = arith.constant 0 : index
    %0 = vector.load %arg2[%c0, %c0_0, %c0_1] : memref<8x16x128xbf16, #tpu.memory_space<vmem>>, vector<1x16x128xbf16>
    %1 = vector.shape_cast %0 : vector<1x16x128xbf16> to vector<16x128xbf16>
    %2 = arith.extf %1 : vector<16x128xbf16> to vector<16x128xf32>
    %c0_2 = arith.constant 0 : index
    %3 = memref.load %arg1[%c0_2] : memref<49xf32, #tpu.memory_space<smem>>
    %4 = vector.broadcast %3 : f32 to vector<16x128xf32>
    %5 = arith.mulf %2, %4 : vector<16x128xf32>
    %c8 = arith.constant 8 : index
    %6 = memref.load %arg1[%c8] : memref<49xf32, #tpu.memory_space<smem>>
    %7 = vector.broadcast %6 : f32 to vector<16x128xf32>
    %8 = arith.mulf %2, %7 : vector<16x128xf32>
    %c16 = arith.constant 16 : index
    %9 = memref.load %arg1[%c16] : memref<49xf32, #tpu.memory_space<smem>>
    %10 = vector.broadcast %9 : f32 to vector<16x128xf32>
    %11 = arith.mulf %2, %10 : vector<16x128xf32>
    %c24 = arith.constant 24 : index
    %12 = memref.load %arg1[%c24] : memref<49xf32, #tpu.memory_space<smem>>
    %13 = vector.broadcast %12 : f32 to vector<16x128xf32>
    %14 = arith.mulf %2, %13 : vector<16x128xf32>
    %c1 = arith.constant 1 : index
    %c0_3 = arith.constant 0 : index
    %c0_4 = arith.constant 0 : index
    %15 = vector.load %arg2[%c1, %c0_3, %c0_4] : memref<8x16x128xbf16, #tpu.memory_space<vmem>>, vector<1x16x128xbf16>
    %16 = vector.shape_cast %15 : vector<1x16x128xbf16> to vector<16x128xbf16>
    %17 = arith.extf %16 : vector<16x128xbf16> to vector<16x128xf32>
    %c1_5 = arith.constant 1 : index
    %18 = memref.load %arg1[%c1_5] : memref<49xf32, #tpu.memory_space<smem>>
    %19 = vector.broadcast %18 : f32 to vector<16x128xf32>
    %20 = arith.mulf %17, %19 : vector<16x128xf32>
    %21 = arith.addf %5, %20 : vector<16x128xf32>
    %c9 = arith.constant 9 : index
    %22 = memref.load %arg1[%c9] : memref<49xf32, #tpu.memory_space<smem>>
    %23 = vector.broadcast %22 : f32 to vector<16x128xf32>
    %24 = arith.mulf %17, %23 : vector<16x128xf32>
    %25 = arith.addf %8, %24 : vector<16x128xf32>
    %c17 = arith.constant 17 : index
    %26 = memref.load %arg1[%c17] : memref<49xf32, #tpu.memory_space<smem>>
    %27 = vector.broadcast %26 : f32 to vector<16x128xf32>
    %28 = arith.mulf %17, %27 : vector<16x128xf32>
    %29 = arith.addf %11, %28 : vector<16x128xf32>
    %c25 = arith.constant 25 : index
    %30 = memref.load %arg1[%c25] : memref<49xf32, #tpu.memory_space<smem>>
    %31 = vector.broadcast %30 : f32 to vector<16x128xf32>
    %32 = arith.mulf %17, %31 : vector<16x128xf32>
    %33 = arith.addf %14, %32 : vector<16x128xf32>
    %c2 = arith.constant 2 : index
    %c0_6 = arith.constant 0 : index
    %c0_7 = arith.constant 0 : index
    %34 = vector.load %arg2[%c2, %c0_6, %c0_7] : memref<8x16x128xbf16, #tpu.memory_space<vmem>>, vector<1x16x128xbf16>
    %35 = vector.shape_cast %34 : vector<1x16x128xbf16> to vector<16x128xbf16>
    %36 = arith.extf %35 : vector<16x128xbf16> to vector<16x128xf32>
    %c2_8 = arith.constant 2 : index
    %37 = memref.load %arg1[%c2_8] : memref<49xf32, #tpu.memory_space<smem>>
    %38 = vector.broadcast %37 : f32 to vector<16x128xf32>
    %39 = arith.mulf %36, %38 : vector<16x128xf32>
    %40 = arith.addf %21, %39 : vector<16x128xf32>
    %c10 = arith.constant 10 : index
    %41 = memref.load %arg1[%c10] : memref<49xf32, #tpu.memory_space<smem>>
    %42 = vector.broadcast %41 : f32 to vector<16x128xf32>
    %43 = arith.mulf %36, %42 : vector<16x128xf32>
    %44 = arith.addf %25, %43 : vector<16x128xf32>
    %c18 = arith.constant 18 : index
    %45 = memref.load %arg1[%c18] : memref<49xf32, #tpu.memory_space<smem>>
    %46 = vector.broadcast %45 : f32 to vector<16x128xf32>
    %47 = arith.mulf %36, %46 : vector<16x128xf32>
    %48 = arith.addf %29, %47 : vector<16x128xf32>
    %c26 = arith.constant 26 : index
    %49 = memref.load %arg1[%c26] : memref<49xf32, #tpu.memory_space<smem>>
    %50 = vector.broadcast %49 : f32 to vector<16x128xf32>
    %51 = arith.mulf %36, %50 : vector<16x128xf32>
    %52 = arith.addf %33, %51 : vector<16x128xf32>
    %c3 = arith.constant 3 : index
    %c0_9 = arith.constant 0 : index
    %c0_10 = arith.constant 0 : index
    %53 = vector.load %arg2[%c3, %c0_9, %c0_10] : memref<8x16x128xbf16, #tpu.memory_space<vmem>>, vector<1x16x128xbf16>
    %54 = vector.shape_cast %53 : vector<1x16x128xbf16> to vector<16x128xbf16>
    %55 = arith.extf %54 : vector<16x128xbf16> to vector<16x128xf32>
    %c3_11 = arith.constant 3 : index
    %56 = memref.load %arg1[%c3_11] : memref<49xf32, #tpu.memory_space<smem>>
    %57 = vector.broadcast %56 : f32 to vector<16x128xf32>
    %58 = arith.mulf %55, %57 : vector<16x128xf32>
    %59 = arith.addf %40, %58 : vector<16x128xf32>
    %c11 = arith.constant 11 : index
    %60 = memref.load %arg1[%c11] : memref<49xf32, #tpu.memory_space<smem>>
    %61 = vector.broadcast %60 : f32 to vector<16x128xf32>
    %62 = arith.mulf %55, %61 : vector<16x128xf32>
    %63 = arith.addf %44, %62 : vector<16x128xf32>
    %c19 = arith.constant 19 : index
    %64 = memref.load %arg1[%c19] : memref<49xf32, #tpu.memory_space<smem>>
    %65 = vector.broadcast %64 : f32 to vector<16x128xf32>
    %66 = arith.mulf %55, %65 : vector<16x128xf32>
    %67 = arith.addf %48, %66 : vector<16x128xf32>
    %c27 = arith.constant 27 : index
    %68 = memref.load %arg1[%c27] : memref<49xf32, #tpu.memory_space<smem>>
    %69 = vector.broadcast %68 : f32 to vector<16x128xf32>
    %70 = arith.mulf %55, %69 : vector<16x128xf32>
    %71 = arith.addf %52, %70 : vector<16x128xf32>
    %c4 = arith.constant 4 : index
    %c0_12 = arith.constant 0 : index
    %c0_13 = arith.constant 0 : index
    %72 = vector.load %arg2[%c4, %c0_12, %c0_13] : memref<8x16x128xbf16, #tpu.memory_space<vmem>>, vector<1x16x128xbf16>
    %73 = vector.shape_cast %72 : vector<1x16x128xbf16> to vector<16x128xbf16>
    %74 = arith.extf %73 : vector<16x128xbf16> to vector<16x128xf32>
    %c4_14 = arith.constant 4 : index
    %75 = memref.load %arg1[%c4_14] : memref<49xf32, #tpu.memory_space<smem>>
    %76 = vector.broadcast %75 : f32 to vector<16x128xf32>
    %77 = arith.mulf %74, %76 : vector<16x128xf32>
    %78 = arith.addf %59, %77 : vector<16x128xf32>
    %c12 = arith.constant 12 : index
    %79 = memref.load %arg1[%c12] : memref<49xf32, #tpu.memory_space<smem>>
    %80 = vector.broadcast %79 : f32 to vector<16x128xf32>
    %81 = arith.mulf %74, %80 : vector<16x128xf32>
    %82 = arith.addf %63, %81 : vector<16x128xf32>
    %c20 = arith.constant 20 : index
    %83 = memref.load %arg1[%c20] : memref<49xf32, #tpu.memory_space<smem>>
    %84 = vector.broadcast %83 : f32 to vector<16x128xf32>
    %85 = arith.mulf %74, %84 : vector<16x128xf32>
    %86 = arith.addf %67, %85 : vector<16x128xf32>
    %c28 = arith.constant 28 : index
    %87 = memref.load %arg1[%c28] : memref<49xf32, #tpu.memory_space<smem>>
    %88 = vector.broadcast %87 : f32 to vector<16x128xf32>
    %89 = arith.mulf %74, %88 : vector<16x128xf32>
    %90 = arith.addf %71, %89 : vector<16x128xf32>
    %c5 = arith.constant 5 : index
    %c0_15 = arith.constant 0 : index
    %c0_16 = arith.constant 0 : index
    %91 = vector.load %arg2[%c5, %c0_15, %c0_16] : memref<8x16x128xbf16, #tpu.memory_space<vmem>>, vector<1x16x128xbf16>
    %92 = vector.shape_cast %91 : vector<1x16x128xbf16> to vector<16x128xbf16>
    %93 = arith.extf %92 : vector<16x128xbf16> to vector<16x128xf32>
    %c5_17 = arith.constant 5 : index
    %94 = memref.load %arg1[%c5_17] : memref<49xf32, #tpu.memory_space<smem>>
    %95 = vector.broadcast %94 : f32 to vector<16x128xf32>
    %96 = arith.mulf %93, %95 : vector<16x128xf32>
    %97 = arith.addf %78, %96 : vector<16x128xf32>
    %c13 = arith.constant 13 : index
    %98 = memref.load %arg1[%c13] : memref<49xf32, #tpu.memory_space<smem>>
    %99 = vector.broadcast %98 : f32 to vector<16x128xf32>
    %100 = arith.mulf %93, %99 : vector<16x128xf32>
    %101 = arith.addf %82, %100 : vector<16x128xf32>
    %c21 = arith.constant 21 : index
    %102 = memref.load %arg1[%c21] : memref<49xf32, #tpu.memory_space<smem>>
    %103 = vector.broadcast %102 : f32 to vector<16x128xf32>
    %104 = arith.mulf %93, %103 : vector<16x128xf32>
    %105 = arith.addf %86, %104 : vector<16x128xf32>
    %c29 = arith.constant 29 : index
    %106 = memref.load %arg1[%c29] : memref<49xf32, #tpu.memory_space<smem>>
    %107 = vector.broadcast %106 : f32 to vector<16x128xf32>
    %108 = arith.mulf %93, %107 : vector<16x128xf32>
    %109 = arith.addf %90, %108 : vector<16x128xf32>
    %c6 = arith.constant 6 : index
    %c0_18 = arith.constant 0 : index
    %c0_19 = arith.constant 0 : index
    %110 = vector.load %arg2[%c6, %c0_18, %c0_19] : memref<8x16x128xbf16, #tpu.memory_space<vmem>>, vector<1x16x128xbf16>
    %111 = vector.shape_cast %110 : vector<1x16x128xbf16> to vector<16x128xbf16>
    %112 = arith.extf %111 : vector<16x128xbf16> to vector<16x128xf32>
    %c6_20 = arith.constant 6 : index
    %113 = memref.load %arg1[%c6_20] : memref<49xf32, #tpu.memory_space<smem>>
    %114 = vector.broadcast %113 : f32 to vector<16x128xf32>
    %115 = arith.mulf %112, %114 : vector<16x128xf32>
    %116 = arith.addf %97, %115 : vector<16x128xf32>
    %c14 = arith.constant 14 : index
    %117 = memref.load %arg1[%c14] : memref<49xf32, #tpu.memory_space<smem>>
    %118 = vector.broadcast %117 : f32 to vector<16x128xf32>
    %119 = arith.mulf %112, %118 : vector<16x128xf32>
    %120 = arith.addf %101, %119 : vector<16x128xf32>
    %c22 = arith.constant 22 : index
    %121 = memref.load %arg1[%c22] : memref<49xf32, #tpu.memory_space<smem>>
    %122 = vector.broadcast %121 : f32 to vector<16x128xf32>
    %123 = arith.mulf %112, %122 : vector<16x128xf32>
    %124 = arith.addf %105, %123 : vector<16x128xf32>
    %c30 = arith.constant 30 : index
    %125 = memref.load %arg1[%c30] : memref<49xf32, #tpu.memory_space<smem>>
    %126 = vector.broadcast %125 : f32 to vector<16x128xf32>
    %127 = arith.mulf %112, %126 : vector<16x128xf32>
    %128 = arith.addf %109, %127 : vector<16x128xf32>
    %c7 = arith.constant 7 : index
    %c0_21 = arith.constant 0 : index
    %c0_22 = arith.constant 0 : index
    %129 = vector.load %arg2[%c7, %c0_21, %c0_22] : memref<8x16x128xbf16, #tpu.memory_space<vmem>>, vector<1x16x128xbf16>
    %130 = vector.shape_cast %129 : vector<1x16x128xbf16> to vector<16x128xbf16>
    %131 = arith.extf %130 : vector<16x128xbf16> to vector<16x128xf32>
    %c7_23 = arith.constant 7 : index
    %132 = memref.load %arg1[%c7_23] : memref<49xf32, #tpu.memory_space<smem>>
    %133 = vector.broadcast %132 : f32 to vector<16x128xf32>
    %134 = arith.mulf %131, %133 : vector<16x128xf32>
    %135 = arith.addf %116, %134 : vector<16x128xf32>
    %c15 = arith.constant 15 : index
    %136 = memref.load %arg1[%c15] : memref<49xf32, #tpu.memory_space<smem>>
    %137 = vector.broadcast %136 : f32 to vector<16x128xf32>
    %138 = arith.mulf %131, %137 : vector<16x128xf32>
    %139 = arith.addf %120, %138 : vector<16x128xf32>
    %c23 = arith.constant 23 : index
    %140 = memref.load %arg1[%c23] : memref<49xf32, #tpu.memory_space<smem>>
    %141 = vector.broadcast %140 : f32 to vector<16x128xf32>
    %142 = arith.mulf %131, %141 : vector<16x128xf32>
    %143 = arith.addf %124, %142 : vector<16x128xf32>
    %c31 = arith.constant 31 : index
    %144 = memref.load %arg1[%c31] : memref<49xf32, #tpu.memory_space<smem>>
    %145 = vector.broadcast %144 : f32 to vector<16x128xf32>
    %146 = arith.mulf %131, %145 : vector<16x128xf32>
    %147 = arith.addf %128, %146 : vector<16x128xf32>
    %c32 = arith.constant 32 : index
    %148 = memref.load %arg1[%c32] : memref<49xf32, #tpu.memory_space<smem>>
    %149 = vector.broadcast %148 : f32 to vector<16x128xf32>
    %150 = arith.addf %135, %149 : vector<16x128xf32>
    %151 = arith.negf %150 : vector<16x128xf32>
    %152 = math.exp %151 : vector<16x128xf32>
    %cst = arith.constant 1.000000e+00 : f32
    %153 = vector.broadcast %cst : f32 to vector<16x128xf32>
    %154 = arith.addf %153, %152 : vector<16x128xf32>
    %155 = arith.divf %153, %154 : vector<16x128xf32>
    %c33 = arith.constant 33 : index
    %156 = memref.load %arg1[%c33] : memref<49xf32, #tpu.memory_space<smem>>
    %157 = vector.broadcast %156 : f32 to vector<16x128xf32>
    %158 = arith.addf %139, %157 : vector<16x128xf32>
    %159 = arith.negf %158 : vector<16x128xf32>
    %160 = math.exp %159 : vector<16x128xf32>
    %cst_24 = arith.constant 1.000000e+00 : f32
    %161 = vector.broadcast %cst_24 : f32 to vector<16x128xf32>
    %162 = arith.addf %161, %160 : vector<16x128xf32>
    %163 = arith.divf %161, %162 : vector<16x128xf32>
    %c34 = arith.constant 34 : index
    %164 = memref.load %arg1[%c34] : memref<49xf32, #tpu.memory_space<smem>>
    %165 = vector.broadcast %164 : f32 to vector<16x128xf32>
    %166 = arith.addf %143, %165 : vector<16x128xf32>
    %167 = arith.negf %166 : vector<16x128xf32>
    %168 = math.exp %167 : vector<16x128xf32>
    %cst_25 = arith.constant 1.000000e+00 : f32
    %169 = vector.broadcast %cst_25 : f32 to vector<16x128xf32>
    %170 = arith.addf %169, %168 : vector<16x128xf32>
    %171 = arith.divf %169, %170 : vector<16x128xf32>
    %c35 = arith.constant 35 : index
    %172 = memref.load %arg1[%c35] : memref<49xf32, #tpu.memory_space<smem>>
    %173 = vector.broadcast %172 : f32 to vector<16x128xf32>
    %174 = arith.addf %147, %173 : vector<16x128xf32>
    %175 = arith.negf %174 : vector<16x128xf32>
    %176 = math.exp %175 : vector<16x128xf32>
    %cst_26 = arith.constant 1.000000e+00 : f32
    %177 = vector.broadcast %cst_26 : f32 to vector<16x128xf32>
    %178 = arith.addf %177, %176 : vector<16x128xf32>
    %179 = arith.divf %177, %178 : vector<16x128xf32>
    %c36 = arith.constant 36 : index
    %180 = memref.load %arg1[%c36] : memref<49xf32, #tpu.memory_space<smem>>
    %181 = vector.broadcast %180 : f32 to vector<16x128xf32>
    %182 = arith.mulf %155, %181 : vector<16x128xf32>
    %c37 = arith.constant 37 : index
    %183 = memref.load %arg1[%c37] : memref<49xf32, #tpu.memory_space<smem>>
    %184 = vector.broadcast %183 : f32 to vector<16x128xf32>
    %185 = arith.mulf %163, %184 : vector<16x128xf32>
    %186 = arith.addf %182, %185 : vector<16x128xf32>
    %c38 = arith.constant 38 : index
    %187 = memref.load %arg1[%c38] : memref<49xf32, #tpu.memory_space<smem>>
    %188 = vector.broadcast %187 : f32 to vector<16x128xf32>
    %189 = arith.mulf %171, %188 : vector<16x128xf32>
    %190 = arith.addf %186, %189 : vector<16x128xf32>
    %c39 = arith.constant 39 : index
    %191 = memref.load %arg1[%c39] : memref<49xf32, #tpu.memory_space<smem>>
    %192 = vector.broadcast %191 : f32 to vector<16x128xf32>
    %193 = arith.mulf %179, %192 : vector<16x128xf32>
    %194 = arith.addf %190, %193 : vector<16x128xf32>
    %c44 = arith.constant 44 : index
    %195 = memref.load %arg1[%c44] : memref<49xf32, #tpu.memory_space<smem>>
    %196 = vector.broadcast %195 : f32 to vector<16x128xf32>
    %197 = arith.addf %194, %196 : vector<16x128xf32>
    %198 = arith.negf %197 : vector<16x128xf32>
    %199 = math.exp %198 : vector<16x128xf32>
    %cst_27 = arith.constant 1.000000e+00 : f32
    %200 = vector.broadcast %cst_27 : f32 to vector<16x128xf32>
    %201 = arith.addf %200, %199 : vector<16x128xf32>
    %202 = arith.divf %200, %201 : vector<16x128xf32>
    %c40 = arith.constant 40 : index
    %203 = memref.load %arg1[%c40] : memref<49xf32, #tpu.memory_space<smem>>
    %204 = vector.broadcast %203 : f32 to vector<16x128xf32>
    %205 = arith.mulf %155, %204 : vector<16x128xf32>
    %c41 = arith.constant 41 : index
    %206 = memref.load %arg1[%c41] : memref<49xf32, #tpu.memory_space<smem>>
    %207 = vector.broadcast %206 : f32 to vector<16x128xf32>
    %208 = arith.mulf %163, %207 : vector<16x128xf32>
    %209 = arith.addf %205, %208 : vector<16x128xf32>
    %c42 = arith.constant 42 : index
    %210 = memref.load %arg1[%c42] : memref<49xf32, #tpu.memory_space<smem>>
    %211 = vector.broadcast %210 : f32 to vector<16x128xf32>
    %212 = arith.mulf %171, %211 : vector<16x128xf32>
    %213 = arith.addf %209, %212 : vector<16x128xf32>
    %c43 = arith.constant 43 : index
    %214 = memref.load %arg1[%c43] : memref<49xf32, #tpu.memory_space<smem>>
    %215 = vector.broadcast %214 : f32 to vector<16x128xf32>
    %216 = arith.mulf %179, %215 : vector<16x128xf32>
    %217 = arith.addf %213, %216 : vector<16x128xf32>
    %c45 = arith.constant 45 : index
    %218 = memref.load %arg1[%c45] : memref<49xf32, #tpu.memory_space<smem>>
    %219 = vector.broadcast %218 : f32 to vector<16x128xf32>
    %220 = arith.addf %217, %219 : vector<16x128xf32>
    %221 = arith.negf %220 : vector<16x128xf32>
    %222 = math.exp %221 : vector<16x128xf32>
    %cst_28 = arith.constant 1.000000e+00 : f32
    %223 = vector.broadcast %cst_28 : f32 to vector<16x128xf32>
    %224 = arith.addf %223, %222 : vector<16x128xf32>
    %225 = arith.divf %223, %224 : vector<16x128xf32>
    %c46 = arith.constant 46 : index
    %226 = memref.load %arg1[%c46] : memref<49xf32, #tpu.memory_space<smem>>
    %227 = vector.broadcast %226 : f32 to vector<16x128xf32>
    %228 = arith.mulf %202, %227 : vector<16x128xf32>
    %c47 = arith.constant 47 : index
    %229 = memref.load %arg1[%c47] : memref<49xf32, #tpu.memory_space<smem>>
    %230 = vector.broadcast %229 : f32 to vector<16x128xf32>
    %231 = arith.mulf %225, %230 : vector<16x128xf32>
    %232 = arith.addf %228, %231 : vector<16x128xf32>
    %c48 = arith.constant 48 : index
    %233 = memref.load %arg1[%c48] : memref<49xf32, #tpu.memory_space<smem>>
    %234 = vector.broadcast %233 : f32 to vector<16x128xf32>
    %235 = arith.addf %232, %234 : vector<16x128xf32>
    %236 = arith.negf %235 : vector<16x128xf32>
    %237 = math.exp %236 : vector<16x128xf32>
    %cst_29 = arith.constant 1.000000e+00 : f32
    %238 = vector.broadcast %cst_29 : f32 to vector<16x128xf32>
    %239 = arith.addf %238, %237 : vector<16x128xf32>
    %240 = arith.divf %238, %239 : vector<16x128xf32>
    %241 = arith.truncf %240 : vector<16x128xf32> to vector<16x128xbf16>
    %c0_30 = arith.constant 0 : index
    %c0_31 = arith.constant 0 : index
    %242 = vector.load %arg3[%c0_30, %c0_31] : memref<16x128xbf16, #tpu.memory_space<vmem>>, vector<16x128xbf16>
    tpu.vector_store %arg3[%c0_30, %c0_31], %241 {strides = array<i32>} : memref<16x128xbf16, #tpu.memory_space<vmem>>, vector<16x128xbf16>,
    return
  }
  func.func @transform_0(%arg0: i32) -> i32 {
    %c0_i32 = arith.constant 0 : i32
    %c0_i32_0 = arith.constant 0 : i32
    return %c0_i32 : i32
  }
  func.func @transform_1(%arg0: i32) -> (i32, i32, i32) {
    %c0_i32 = arith.constant 0 : i32
    %c0_i32_0 = arith.constant 0 : i32
    %c0_i32_1 = arith.constant 0 : i32
    return %c0_i32, %arg0, %c0_i32_0 : i32, i32, i32
  }
  func.func @transform_2(%arg0: i32) -> (i32, i32) {
    %c0_i32 = arith.constant 0 : i32
    %c0_i32_0 = arith.constant 0 : i32
    return %arg0, %c0_i32 : i32, i32
  }
}

</mosaic_0001>

<bundles_post_ra>
// kernel: tpu_custom_call.1
= control target key start
LH: loop header
LB: loop body
LE: loop exit
PB: predicated region body
PF: predicated region fallthrough
CT: control target
= control target key end

     0   :  { %7 = vsyncpa [#allocation5], 0  ;;  %s1456_s0 = inlined_call_operand.hbm [shape: f32[49], index: 0, kind: input, shape index: {}]   ;;  %s1457_s1 = inlined_call_operand.hbm [shape: bf16[8,32,128], index: 1, kind: input, shape index: {}]   ;;  %s1458_s2 = inlined_call_operand.hbm [shape: bf16[32,128], index: 2, kind: output, shape index: {}]  }
   0x1   :  { %8 = vsyncpa [#allocation3], 0 }
   0x2   :  { %10 = vsyncpa [#allocation3 + $0x1], 0 }
   0x3   :  { %11 = vsyncpa [#allocation4], 0 }
   0x4   :  { %13 = vsyncpa [#allocation4 + $0x1], 0  ;;  %s1076_s9 = smov 0   ;;  %s1078_s10 = smov 0  }
   0x5   :  { %s1080_s11 = smov 0   ;;  %s1082_s12 = smov 0  }
   0x6 LB: > { %s1097_s13 = sadd.s32 4294967295, %s1049_s12   ;;  %s699_s14 = sadd.s32 4294967294, %s1049_s12   ;;  %s1049_s12 = sphi %s1082_s12, %s1467_s12   ;;  %s1045_s11 = sphi %s1080_s11, %s1466_s11   ;;  %s1041_s10 = sphi %s1078_s10, %s1465_s10   ;;  %s1037_s9 = sphi %s1076_s9, %s1464_s9  }
   0x7   : > { %s1101_s15 = sadd.s32 1, %s1049_s12   ;;  %s47_s16 = sadd.s32 1, %s1045_s11 }
   0x8   : > { %s44_s17 = ssub.s32 %s1049_s12, %s1101_s15  ;;  %p54_p0 = scmp.ne.s32.totalorder %s1045_s11, %s1041_s10 }
   0x9   : > { %p45_p1 = scmp.eq.s32.totalorder %s44_s17, 0  ;;  %p55_p2 = scmp.eq.s32.totalorder %s1049_s12, 0 }
   0xa   : > { %p60_p3 = scmp.ne.s32.totalorder %s1041_s10, %s1037_s9  ;;  %p61_p4 = scmp.eq.s32.totalorder %s1097_s13, 0 }
   0xb   : > { %s1113_s18 = scalar_select %p45_p1, %s1045_s11, %s47_s16  }
   0xc   : > { %p1115_p5 = por %p55_p2, %p54_p0  ;;  %p1121_p6 = por %p61_p4, %p60_p3 }
   0xd   : > { %p84_p7 = scmp.eq.s32.totalorder %s1097_s13, 1  ;;  %p90_p8 = scmp.eq.s32.totalorder %s699_s14, 1 }
   0xe   : > { %p700_p9 = scmp.ge.s32.totalorder %s1049_s12, 1  ;;  %p97_p10 = scmp.lt.s32.totalorder %s1049_s12, 3 }
   0xf   : > { %p1128_p11 = por %p84_p7, %p54_p0  ;;  %p1132_p12 = por %p90_p8, %p60_p3 }
  0x10   : > { %p1136_p13 = pnand %p700_p9, %p97_p10  ;;  %s966_s26 = scalar_lea.hbm %s1456_s0, 16 }
  0x11   : > { %p967_p0 = scmp.ne.s32.totalorder %s1456_s0, %s966_s26  ;;  %p973_p9 = scmp.lt.u32.totalorder %s966_s26, %s1456_s0 }
  0x12   : > { %p858_p1 = pneg %p1136_p13 }
  0x14   : > { %p859_p2 = pnand %p858_p1, %p61_p4 }
  0x16   : > { %p968_p3 = pneg %p859_p2 }
  0x18   : > { %p969_p7 = pnand %p968_p3, %p967_p0 }
  0x1a   : > { %p970_p8 = pneg %p969_p7 }
  0x1c   : > { %p975_p10 = pnand %p973_p9, %p970_p8 }
  0x1e   : > { %978 = shalt.err (!%p975_p10)
}
  0x1f   : > { %s1051_s3 = smov [#allocation2]   ;;  %p702_p1 = scmp.ge.s32.totalorder %s1049_s12, 2 }
  0x20   : > { %861 = dma.hbm_to_smem (!%p859_p2), %s1456_s0, 16, %s1051_s3, [#allocation5]  }
  0x21   : > { %115 = sbr.rel (%p702_p1) target bundleno = 53 (0x35), region = 20 }
  0x28   : > { %s119_s6 = sand.u32 1, %s1045_s11   ;;  %s795_s7 = sshll.u32 %s1049_s12, 7 }
  0x29   : > { %s703_s8 = sshll.u32 %s119_s6, 6  ;;  %s129_s17 = scalar_lea.hbm %s1457_s1, %s795_s7 }
  0x2a   : > { %s845_s24 = scalar_select %p1115_p5, [#allocation0], [#allocation10] }
  0x2b   : > { %s123_s25 = scalar_lea.vmem [#allocation6], %s703_s8  ;;  %s1052_s28 = smov 256  }
  0x2c   : > { %s142_s26 = sshll.u32 %s123_s25, 4  ;;  %s134_s27 = sld [smem:[%s845_s24]]   ;;  %s143_s26 = int_to_ptr.vmem [resolvable:$true] %s142_s26 }
  0x2d   : > { %846 = sst [smem:[#allocation9]] (%p1115_p5), %s1052_s28  ;;  %s1053_s29 = smov 128  }
  0x2e   : > { %847 = sst [smem:[#allocation9 + $0x1]] (%p1115_p5), %s1053_s29  ;;  %s1054_s30 = smov 2  }
  0x2f   : > { %848 = sst [smem:[#allocation9 + $0x2]] (%p1115_p5), %s1054_s30  ;;  %s1055_s3 = smov 64  }
  0x30   : > { %849 = sst [smem:[#allocation9 + $0x3]] (%p1115_p5), %s1055_s3  ;;  %s1056_s5 = smov 4  }
  0x31   : > { %850 = sst [smem:[#allocation9 + $0x4]] (%p1115_p5), %s1055_s3  ;;  %s120_s8 = scalar_lea.sflag [#allocation3], %s119_s6 }
  0x32   : > { %s706_s4 = sshll.u32 %s134_s27, 26  ;;  %851 = sst [smem:[#allocation9 + $0x5]] (%p1115_p5), %s1056_s5 }
  0x33   : > { %s707_s7 = sadd.s32 134217728, %s706_s4  ;;  %s1057_s14 = smov [#allocation8]  }
  0x34   : > { %852 = dma.general (%p1115_p5), %s129_s17, 1024, %s143_s26, %s120_s8, %s1057_s14, [#allocation9], %s707_s7, 0  }
  0x35 PF: > { %167 = sbr.rel (%p1136_p13) target bundleno = 230 (0xe6), region = 28 }
  0x3c   : > { %1024 = dma.done.wait (%p61_p4), [#allocation5], 16  }
  0x3d   : > { %1026 = vsyncadd (%p61_p4), [#allocation5], 4294967280  ;;  %s1187_s16 = sand.u32 1, %s1041_s10  }
  0x3e   : > { %s710_s6 = sshll.u32 %s1187_s16, 6  ;;  %s174_s24 = scalar_lea.sflag [#allocation3], %s1187_s16 }
  0x3f   : > { %s177_s19 = scalar_lea.vmem [#allocation6], %s710_s6 }
  0x40   : > { %1028 = dma.done.wait (%p1121_p6), %s174_s24, 1024  }
  0x41   : > { %1030 = vsyncadd (%p1121_p6), %s174_s24, 4294966272 }
  0x42   : > { %182 = sfence }
  0x43   : > { %v800_v0 = vld [vmem:[%s177_s19] sm:$0xff]   ;;  %s1195_s23 = sld [smem:[#allocation2]]  ;;  %v836_v1 = vld [vmem:[%s177_s19 + $0x8] sm:$0xff]   ;;  %v837_v2 = vld [vmem:[%s177_s19 + $0x10] sm:$0xff]   ;;  %s1203_s20 = sld [smem:[#allocation2 + $0x1]] }
  0x44   : > { %s1197_s17 = sld [smem:[#allocation2 + $0x8]]  ;;  %v838_v3 = vld [vmem:[%s177_s19 + $0x18] sm:$0xff]   ;;  %v839_v4 = vld [vmem:[%s177_s19 + $0x20] sm:$0xff]   ;;  %v840_v5 = vld [vmem:[%s177_s19 + $0x28] sm:$0xff]   ;;  %v801_v6 = vunpack.c.l.bf16 %v800_v0  ;;  %v802_v7 = vunpack.c.h.bf16 %v800_v0  ;;  %v805_v8 = vunpack.c.l.bf16 %v836_v1  ;;  %v806_v9 = vunpack.c.h.bf16 %v836_v1  ;;  %s1205_s27 = sld [smem:[#allocation2 + $0x9]] }
  0x45   : > { %s1199_s25 = sld [smem:[#allocation2 + $0x10]]  ;;  %v841_v10 = vld [vmem:[%s177_s19 + $0x30] sm:$0xff]   ;;  %v842_v11 = vld [vmem:[%s177_s19 + $0x38] sm:$0xff]   ;;  %s1207_s28 = sld [smem:[#allocation2 + $0x11]]  ;;  %v1211_v12 = vunpack.c.l.bf16 %v837_v2  ;;  %v1213_v13 = vunpack.c.h.bf16 %v837_v2  ;;  %v1215_v14 = vunpack.c.l.bf16 %v838_v3  ;;  %v1217_v15 = vunpack.c.h.bf16 %v838_v3 }
  0x46   : > { %s1201_s26 = sld [smem:[#allocation2 + $0x18]]  ;;  %s1209_s29 = sld [smem:[#allocation2 + $0x19]]  ;;  %v1219_v16 = vunpack.c.l.bf16 %v839_v4  ;;  %v1221_v17 = vunpack.c.h.bf16 %v839_v4  ;;  %v1223_v18 = vunpack.c.l.bf16 %v840_v5  ;;  %v1225_v19 = vunpack.c.h.bf16 %v840_v5 }
  0x47   : > { %s1228_s30 = sld [smem:[#allocation2 + $0x2]]  ;;  %v1232_v21 = vunpack.c.l.bf16 %v841_v10  ;;  %v1234_v22 = vunpack.c.h.bf16 %v841_v10  ;;  %v1236_v23 = vunpack.c.l.bf16 %v842_v11  ;;  %v1243_v27 = vunpack.c.h.bf16 %v842_v11  ;;  %s1251_s7 = sld [smem:[#allocation2 + $0x3]] }
  0x48   : > { %s1230_s3 = sld [smem:[#allocation2 + $0xa]]  ;;  %s1253_s8 = sld [smem:[#allocation2 + $0xb]] }
  0x49   : > { %v206_v20 = vstv %s1195_s23  ;;  %s1239_s4 = sld [smem:[#allocation2 + $0x12]]  ;;  %v227_v36 = vstv %s1203_s20  ;;  %s1255_s14 = sld [smem:[#allocation2 + $0x13]] }
  0x4a   : > { %v207_v24 = vmul.f32 %v801_v6, %v206_v20  ;;  %v208_v25 = vmul.f32 %v802_v7, %v206_v20  ;;  %v210_v26 = vstv %s1197_s17  ;;  %s1241_s5 = sld [smem:[#allocation2 + $0x1a]]  ;;  %v233_v37 = vstv %s1205_s27  ;;  %s1257_s6 = sld [smem:[#allocation2 + $0x1b]] }
  0x4b   : > { %v211_v28 = vmul.f32 %v801_v6, %v210_v26  ;;  %v212_v29 = vmul.f32 %v802_v7, %v210_v26  ;;  %v214_v30 = vstv %s1199_s25  ;;  %v239_v38 = vstv %s1207_s28  ;;  %s1267_s24 = sld [smem:[#allocation2 + $0x4]]  ;;  %s1287_s25 = sld [smem:[#allocation2 + $0x5]] }
  0x4c   : > { %v218_v31 = vstv %s1201_s26  ;;  %v215_v32 = vmul.f32 %v801_v6, %v214_v30  ;;  %v216_v33 = vmul.f32 %v802_v7, %v214_v30  ;;  %v245_v39 = vstv %s1209_s29  ;;  %s1269_s19 = sld [smem:[#allocation2 + $0xc]]  ;;  %s1289_s26 = sld [smem:[#allocation2 + $0xd]] }
  0x4d   : > { %v219_v34 = vmul.f32 %v801_v6, %v218_v31  ;;  %v220_v35 = vmul.f32 %v802_v7, %v218_v31  ;;  %v228_v40 = vmul.f32 %v805_v8, %v227_v36  ;;  %v229_v41 = vmul.f32 %v806_v9, %v227_v36  ;;  %s1275_s23 = sld [smem:[#allocation2 + $0x14]]  ;;  %s1295_s20 = sld [smem:[#allocation2 + $0x15]] }
  0x4e   : > { %v234_v42 = vmul.f32 %v805_v8, %v233_v37  ;;  %v235_v43 = vmul.f32 %v806_v9, %v233_v37  ;;  %v240_v44 = vmul.f32 %v805_v8, %v239_v38  ;;  %v241_v45 = vmul.f32 %v806_v9, %v239_v38  ;;  %s1277_s17 = sld [smem:[#allocation2 + $0x1c]]  ;;  %s1297_s27 = sld [smem:[#allocation2 + $0x1d]] }
  0x4f   : > { %v246_v46 = vmul.f32 %v805_v8, %v245_v39  ;;  %v247_v47 = vmul.f32 %v806_v9, %v245_v39  ;;  %v230_v48 = vadd.f32 %v228_v40, %v207_v24  ;;  %v231_v49 = vadd.f32 %v229_v41, %v208_v25  ;;  %s1307_s28 = sld [smem:[#allocation2 + $0x6]] }
  0x50   : > { %v236_v50 = vadd.f32 %v234_v42, %v211_v28  ;;  %v237_v51 = vadd.f32 %v235_v43, %v212_v29  ;;  %v242_v52 = vadd.f32 %v240_v44, %v215_v32  ;;  %v243_v53 = vadd.f32 %v241_v45, %v216_v33  ;;  %s1309_s29 = sld [smem:[#allocation2 + $0xe]] }
  0x51   : > { %v248_v54 = vadd.f32 %v246_v46, %v219_v34  ;;  %v249_v55 = vadd.f32 %v247_v47, %v220_v35  ;;  %v256_v56 = vstv %s1228_s30  ;;  %v262_v57 = vstv %s1230_s3  ;;  %s1315_s30 = sld [smem:[#allocation2 + $0x16]] }
  0x52   : > { %v268_v58 = vstv %s1239_s4  ;;  %v274_v59 = vstv %s1241_s5  ;;  %v257_v60 = vmul.f32 %v1211_v12, %v256_v56  ;;  %v258_v61 = vmul.f32 %v1213_v13, %v256_v56  ;;  %s1317_s3 = sld [smem:[#allocation2 + $0x1e]]  ;;  %s1327_s4 = sld [smem:[#allocation2 + $0x7]] }
  0x53   : > { %v263_v62 = vmul.f32 %v1211_v12, %v262_v57  ;;  %v264_v63 = vmul.f32 %v1213_v13, %v262_v57  ;;  %v269_v0 = vmul.f32 %v1211_v12, %v268_v58  ;;  %v270_v1 = vmul.f32 %v1213_v13, %v268_v58  ;;  %s1329_s5 = sld [smem:[#allocation2 + $0xf]] }
  0x54   : > { %v275_v2 = vmul.f32 %v1211_v12, %v274_v59  ;;  %v276_v3 = vmul.f32 %v1213_v13, %v274_v59  ;;  %v259_v4 = vadd.f32 %v257_v60, %v230_v48  ;;  %v260_v5 = vadd.f32 %v258_v61, %v231_v49 }
  0x55   : > { %v265_v6 = vadd.f32 %v263_v62, %v236_v50  ;;  %v266_v7 = vadd.f32 %v264_v63, %v237_v51  ;;  %v271_v8 = vadd.f32 %v269_v0, %v242_v52  ;;  %v272_v9 = vadd.f32 %v270_v1, %v243_v53 }
  0x56   : > { %v277_v10 = vadd.f32 %v275_v2, %v248_v54  ;;  %v278_v11 = vadd.f32 %v276_v3, %v249_v55  ;;  %v285_v20 = vstv %s1251_s7  ;;  %v291_v24 = vstv %s1253_s8  ;;  %s1335_s7 = sld [smem:[#allocation2 + $0x17]] }
  0x57   : > { %v297_v25 = vstv %s1255_s14  ;;  %v303_v26 = vstv %s1257_s6  ;;  %v286_v12 = vmul.f32 %v1215_v14, %v285_v20  ;;  %v287_v13 = vmul.f32 %v1217_v15, %v285_v20  ;;  %s1337_s8 = sld [smem:[#allocation2 + $0x1f]]  ;;  %s1347_s14 = sld [smem:[#allocation2 + $0x20]] }
  0x58   : > { %v292_v28 = vmul.f32 %v1215_v14, %v291_v24  ;;  %v293_v29 = vmul.f32 %v1217_v15, %v291_v24  ;;  %v298_v30 = vmul.f32 %v1215_v14, %v297_v25  ;;  %v299_v31 = vmul.f32 %v1217_v15, %v297_v25  ;;  %s1349_s6 = sld [smem:[#allocation2 + $0x21]] }
  0x59   : > { %v304_v32 = vmul.f32 %v1215_v14, %v303_v26  ;;  %v305_v33 = vmul.f32 %v1217_v15, %v303_v26  ;;  %v288_v34 = vadd.f32 %v286_v12, %v259_v4  ;;  %v289_v35 = vadd.f32 %v287_v13, %v260_v5 }
  0x5a   : > { %v294_v36 = vadd.f32 %v292_v28, %v265_v6  ;;  %v295_v37 = vadd.f32 %v293_v29, %v266_v7  ;;  %v300_v38 = vadd.f32 %v298_v30, %v271_v8  ;;  %v301_v39 = vadd.f32 %v299_v31, %v272_v9 }
  0x5b   : > { %v306_v40 = vadd.f32 %v304_v32, %v277_v10  ;;  %v307_v41 = vadd.f32 %v305_v33, %v278_v11  ;;  %v314_v42 = vstv %s1267_s24  ;;  %v320_v43 = vstv %s1269_s19  ;;  %s1355_s24 = sld [smem:[#allocation2 + $0x22]]  ;;  %s1357_s19 = sld [smem:[#allocation2 + $0x23]] }
  0x5c   : > { %v326_v44 = vstv %s1275_s23  ;;  %v332_v45 = vstv %s1277_s17  ;;  %v315_v14 = vmul.f32 %v1219_v16, %v314_v42  ;;  %v316_v15 = vmul.f32 %v1221_v17, %v314_v42  ;;  %s1375_s23 = sld [smem:[#allocation2 + $0x24]]  ;;  %s1377_s17 = sld [smem:[#allocation2 + $0x28]] }
  0x5d   : > { %v321_v46 = vmul.f32 %v1219_v16, %v320_v43  ;;  %v322_v47 = vmul.f32 %v1221_v17, %v320_v43  ;;  %v327_v48 = vmul.f32 %v1219_v16, %v326_v44  ;;  %v328_v49 = vmul.f32 %v1221_v17, %v326_v44 }
  0x5e   : > { %v333_v50 = vmul.f32 %v1219_v16, %v332_v45  ;;  %v334_v51 = vmul.f32 %v1221_v17, %v332_v45  ;;  %v317_v52 = vadd.f32 %v315_v14, %v288_v34  ;;  %v318_v53 = vadd.f32 %v316_v15, %v289_v35 }
  0x5f   : > { %v323_v54 = vadd.f32 %v321_v46, %v294_v36  ;;  %v324_v55 = vadd.f32 %v322_v47, %v295_v37  ;;  %v329_v56 = vadd.f32 %v327_v48, %v300_v38  ;;  %v330_v57 = vadd.f32 %v328_v49, %v301_v39 }
  0x60   : > { %v335_v58 = vadd.f32 %v333_v50, %v306_v40  ;;  %v336_v59 = vadd.f32 %v334_v51, %v307_v41  ;;  %v343_v60 = vstv %s1287_s25  ;;  %v349_v61 = vstv %s1289_s26  ;;  %s1379_s25 = sld [smem:[#allocation2 + $0x25]]  ;;  %s1381_s26 = sld [smem:[#allocation2 + $0x29]] }
  0x61   : > { %v355_v62 = vstv %s1295_s20  ;;  %v361_v63 = vstv %s1297_s27  ;;  %v344_v16 = vmul.f32 %v1223_v18, %v343_v60  ;;  %v345_v17 = vmul.f32 %v1225_v19, %v343_v60  ;;  %s1383_s20 = sld [smem:[#allocation2 + $0x26]]  ;;  %s1385_s27 = sld [smem:[#allocation2 + $0x2a]] }
  0x62   : > { %v350_v0 = vmul.f32 %v1223_v18, %v349_v61  ;;  %v351_v1 = vmul.f32 %v1225_v19, %v349_v61  ;;  %v356_v2 = vmul.f32 %v1223_v18, %v355_v62  ;;  %v357_v3 = vmul.f32 %v1225_v19, %v355_v62 }
  0x63   : > { %v362_v4 = vmul.f32 %v1223_v18, %v361_v63  ;;  %v363_v5 = vmul.f32 %v1225_v19, %v361_v63  ;;  %v346_v6 = vadd.f32 %v344_v16, %v317_v52  ;;  %v347_v7 = vadd.f32 %v345_v17, %v318_v53 }
  0x64   : > { %v352_v8 = vadd.f32 %v350_v0, %v323_v54  ;;  %v353_v9 = vadd.f32 %v351_v1, %v324_v55  ;;  %v358_v10 = vadd.f32 %v356_v2, %v329_v56  ;;  %v359_v11 = vadd.f32 %v357_v3, %v330_v57 }
  0x65   : > { %v364_v20 = vadd.f32 %v362_v4, %v335_v58  ;;  %v365_v24 = vadd.f32 %v363_v5, %v336_v59  ;;  %v372_v25 = vstv %s1307_s28  ;;  %v378_v26 = vstv %s1309_s29  ;;  %s1387_s28 = sld [smem:[#allocation2 + $0x27]]  ;;  %s1389_s29 = sld [smem:[#allocation2 + $0x2c]] }
  0x66   : > { %v384_v12 = vstv %s1315_s30  ;;  %v390_v13 = vstv %s1317_s3  ;;  %v373_v18 = vmul.f32 %v1232_v21, %v372_v25  ;;  %v374_v19 = vmul.f32 %v1234_v22, %v372_v25  ;;  %s1391_s30 = sld [smem:[#allocation2 + $0x2b]]  ;;  %s1393_s3 = sld [smem:[#allocation2 + $0x2d]] }
  0x67   : > { %v379_v28 = vmul.f32 %v1232_v21, %v378_v26  ;;  %v380_v29 = vmul.f32 %v1234_v22, %v378_v26  ;;  %v385_v30 = vmul.f32 %v1232_v21, %v384_v12  ;;  %v386_v31 = vmul.f32 %v1234_v22, %v384_v12 }
  0x68   : > { %v391_v32 = vmul.f32 %v1232_v21, %v390_v13  ;;  %v392_v33 = vmul.f32 %v1234_v22, %v390_v13  ;;  %v375_v34 = vadd.f32 %v373_v18, %v346_v6  ;;  %v376_v35 = vadd.f32 %v374_v19, %v347_v7 }
  0x69   : > { %v381_v36 = vadd.f32 %v379_v28, %v352_v8  ;;  %v382_v37 = vadd.f32 %v380_v29, %v353_v9  ;;  %v387_v38 = vadd.f32 %v385_v30, %v358_v10  ;;  %v388_v39 = vadd.f32 %v386_v31, %v359_v11 }
  0x6a   : > { %v393_v40 = vadd.f32 %v391_v32, %v364_v20  ;;  %v394_v41 = vadd.f32 %v392_v33, %v365_v24  ;;  %v401_v42 = vstv %s1327_s4  ;;  %v407_v43 = vstv %s1329_s5  ;;  %s783_s4 = sld [smem:[#allocation2 + $0x2e]]  ;;  %s784_s5 = sld [smem:[#allocation2 + $0x2f]] }
  0x6b   : > { %v413_v44 = vstv %s1335_s7  ;;  %v419_v45 = vstv %s1337_s8  ;;  %v402_v21 = vmul.f32 %v1236_v23, %v401_v42  ;;  %v403_v22 = vmul.f32 %v1243_v27, %v401_v42  ;;  %s785_s7 = sld [smem:[#allocation2 + $0x30]]  ;;  %s711_s8 = sshll.u32 %s1187_s16, 3 }
  0x6c   : > { %v408_v14 = vmul.f32 %v1236_v23, %v407_v43  ;;  %v409_v15 = vmul.f32 %v1243_v27, %v407_v43  ;;  %v414_v46 = vmul.f32 %v1236_v23, %v413_v44  ;;  %v415_v47 = vmul.f32 %v1243_v27, %v413_v44 }
  0x6d   : > { %v420_v48 = vmul.f32 %v1236_v23, %v419_v45  ;;  %v421_v49 = vmul.f32 %v1243_v27, %v419_v45  ;;  %v404_v50 = vadd.f32 %v402_v21, %v375_v34  ;;  %v405_v51 = vadd.f32 %v403_v22, %v376_v35 }
  0x6e   : > { %v410_v52 = vadd.f32 %v408_v14, %v381_v36  ;;  %v411_v53 = vadd.f32 %v409_v15, %v382_v37  ;;  %v416_v54 = vadd.f32 %v414_v46, %v387_v38  ;;  %v417_v55 = vadd.f32 %v415_v47, %v388_v39 }
  0x6f   : > { %v422_v56 = vadd.f32 %v420_v48, %v393_v40  ;;  %v423_v57 = vadd.f32 %v421_v49, %v394_v41  ;;  %v425_v58 = vstv %s1347_s14  ;;  %v441_v59 = vstv %s1349_s6  ;;  %s798_s14 = sshll.u32 %s1097_s13, 7  ;;  %s198_s6 = scalar_lea.vmem [#allocation7], %s711_s8 }
  0x70   : > { %v457_v60 = vstv %s1355_s24  ;;  %v473_v61 = vstv %s1357_s19  ;;  %v426_v62 = vadd.f32 %v425_v58, %v404_v50  ;;  %v427_v63 = vadd.f32 %v425_v58, %v405_v51  ;;  %s614_s24 = sshll.u32 %s198_s6, 4  ;;  %s1058_s13 = smov [#allocation7]   ;;  %s1412_s24 = int_to_ptr.vmem [resolvable:$true] %s614_s24 }
  0x71   : > { %v442_v16 = vadd.f32 %v441_v59, %v410_v52  ;;  %v443_v17 = vadd.f32 %v441_v59, %v411_v53  ;;  %v458_v0 = vadd.f32 %v457_v60, %v416_v54  ;;  %v459_v23 = vadd.f32 %v457_v60, %v417_v55 }
  0x72   : > { %v758_v1 = vmul.f32 -1.442695, %v426_v62  ;;  %v759_v27 = vmul.f32 -1.442695, %v427_v63  ;;  %v474_v3 = vadd.f32 %v473_v61, %v422_v56  ;;  %v475_v5 = vadd.f32 %v473_v61, %v423_v57 }
  0x73   : > { %v761_v2 = vmul.f32 -1.442695, %v442_v16  ;;  %v762_v4 = vmul.f32 -1.442695, %v443_v17  ;;  %v764_v6 = vmul.f32 -1.442695, %v458_v0  ;;  %v489_v34 = vstv %s1375_s23 }
  0x74   : > { %910 = vpow2.f32 %v758_v1  ;;  %v765_v7 = vmul.f32 -1.442695, %v459_v23  ;;  %v767_v8 = vmul.f32 -1.442695, %v474_v3  ;;  %v768_v9 = vmul.f32 -1.442695, %v475_v5 }
  0x75   : > { %912 = vpow2.f32 %v759_v27  ;;  %v527_v35 = vstv %s1377_s17  ;;  %v493_v37 = vstv %s1379_s25  ;;  %v531_v38 = vstv %s1381_s26  ;;  %s1410_s17 = scalar_lea.hbm %s1458_s2, %s798_s14  ;;  %s601_s25 = scalar_lea.sflag [#allocation4], %s1187_s16 }
  0x76   : > { %914 = vpow2.f32 %v761_v2  ;;  %v499_v44 = vstv %s1383_s20  ;;  %v537_v21 = vstv %s1385_s27  ;;  %v505_v15 = vstv %s1387_s28  ;;  %s979_s26 = scalar_lea.vmem %s1412_s24, 128  ;;  %s983_s20 = sshll.u32 %s1058_s13, 4  ;;  %s984_s20 = int_to_ptr.vmem [resolvable:$false] %s983_s20 }
  0x77   : > { %916 = vpow2.f32 %v762_v4  ;;  %v511_v46 = vstv %s1389_s29  ;;  %v543_v51 = vstv %s1391_s30  ;;  %v549_v52 = vstv %s1393_s3  ;;  %p980_p4 = scmp.ne.s32.totalorder %s1412_s24, %s979_s26  ;;  %s985_s27 = scalar_lea.vmem %s984_s20, 256 }
  0x78   : > { %918 = vpow2.f32 %v764_v6  ;;  %p986_p13 = scmp.lt.s32.totalorder %s1412_s24, %s984_s20  ;;  %p987_p2 = scmp.lt.s32.totalorder %s985_s27, %s979_s26 }
  0x79   : > { %920 = vpow2.f32 %v765_v7  ;;  %p981_p5 = pnand %p980_p4, %p1128_p11 }
  0x7a   : > { %922 = vpow2.f32 %v767_v8  ;;  %p988_p0 = por %p987_p2, %p986_p13 }
  0x7b   : > { %924 = vpow2.f32 %v768_v9  ;;  %p982_p6 = pneg %p981_p5 }
  0x7d   : > { %p989_p3 = pnand %p988_p0, %p982_p6 }
  0x7e   : > { %v911_v10 = vpop.eup %910 }
  0x7f   : > { %v913_v11 = vpop.eup %912  ;;  %v434_v20 = vadd.f32 1.0, %v911_v10 }
  0x80   : > { %v915_v24 = vpop.eup %914  ;;  %v435_v25 = vadd.f32 1.0, %v913_v11 }
  0x81   : > { %v917_v26 = vpop.eup %916  ;;  %926 = vrcp.f32 %v434_v20  ;;  %v450_v12 = vadd.f32 1.0, %v915_v24 }
  0x82   : > { %v919_v13 = vpop.eup %918  ;;  %928 = vrcp.f32 %v435_v25  ;;  %v451_v18 = vadd.f32 1.0, %v917_v26 }
  0x83   : > { %v921_v19 = vpop.eup %920  ;;  %930 = vrcp.f32 %v450_v12  ;;  %v466_v28 = vadd.f32 1.0, %v919_v13 }
  0x84   : > { %v923_v29 = vpop.eup %922  ;;  %932 = vrcp.f32 %v451_v18  ;;  %v467_v30 = vadd.f32 1.0, %v921_v19 }
  0x85   : > { %v925_v31 = vpop.eup %924  ;;  %934 = vrcp.f32 %v466_v28  ;;  %v482_v32 = vadd.f32 1.0, %v923_v29 }
  0x86   : > { %936 = vrcp.f32 %v467_v30  ;;  %v483_v33 = vadd.f32 1.0, %v925_v31 }
  0x87   : > { %938 = vrcp.f32 %v482_v32  ;;  %v565_v32 = vstv %s783_s4 }
  0x88   : > { %940 = vrcp.f32 %v483_v33 }
  0x8b   : > { %v927_v36 = vpop.eup %926 }
  0x8c   : > { %v929_v39 = vpop.eup %928  ;;  %v490_v40 = vmul.f32 %v927_v36, %v489_v34  ;;  %v528_v41 = vmul.f32 %v927_v36, %v527_v35 }
  0x8d   : > { %v931_v42 = vpop.eup %930  ;;  %v491_v43 = vmul.f32 %v929_v39, %v489_v34  ;;  %v529_v45 = vmul.f32 %v929_v39, %v527_v35  ;;  %v569_v34 = vstv %s784_s5 }
  0x8e   : > { %v933_v22 = vpop.eup %932  ;;  %v494_v14 = vmul.f32 %v931_v42, %v493_v37  ;;  %v532_v47 = vmul.f32 %v931_v42, %v531_v38  ;;  %v575_v42 = vstv %s785_s7 }
  0x8f   : > { %v935_v48 = vpop.eup %934  ;;  %v495_v49 = vmul.f32 %v933_v22, %v493_v37  ;;  %v533_v50 = vmul.f32 %v933_v22, %v531_v38 }
  0x90   : > { %v937_v53 = vpop.eup %936  ;;  %v496_v54 = vadd.f32 %v494_v14, %v490_v40  ;;  %v500_v55 = vmul.f32 %v935_v48, %v499_v44  ;;  %v534_v56 = vadd.f32 %v532_v47, %v528_v41  ;;  %v538_v57 = vmul.f32 %v935_v48, %v537_v21 }
  0x91   : > { %v939_v58 = vpop.eup %938  ;;  %v497_v59 = vadd.f32 %v495_v49, %v491_v43  ;;  %v501_v60 = vmul.f32 %v937_v53, %v499_v44  ;;  %v535_v61 = vadd.f32 %v533_v50, %v529_v45  ;;  %v539_v62 = vmul.f32 %v937_v53, %v537_v21 }
  0x92   : > { %v941_v63 = vpop.eup %940  ;;  %v502_v16 = vadd.f32 %v500_v55, %v496_v54  ;;  %v506_v17 = vmul.f32 %v939_v58, %v505_v15  ;;  %v540_v0 = vadd.f32 %v538_v57, %v534_v56  ;;  %v544_v23 = vmul.f32 %v939_v58, %v543_v51 }
  0x93   : > { %v503_v1 = vadd.f32 %v501_v60, %v497_v59  ;;  %v507_v27 = vmul.f32 %v941_v63, %v505_v15  ;;  %v541_v2 = vadd.f32 %v539_v62, %v535_v61  ;;  %v545_v3 = vmul.f32 %v941_v63, %v543_v51 }
  0x94   : > { %v508_v4 = vadd.f32 %v506_v17, %v502_v16  ;;  %v546_v5 = vadd.f32 %v544_v23, %v540_v0 }
  0x95   : > { %v509_v6 = vadd.f32 %v507_v27, %v503_v1  ;;  %v547_v7 = vadd.f32 %v545_v3, %v541_v2 }
  0x96   : > { %v512_v8 = vadd.f32 %v511_v46, %v508_v4  ;;  %v550_v9 = vadd.f32 %v549_v52, %v546_v5 }
  0x97   : > { %v513_v10 = vadd.f32 %v511_v46, %v509_v6  ;;  %v551_v11 = vadd.f32 %v549_v52, %v547_v7 }
  0x98   : > { %v774_v20 = vmul.f32 -1.442695, %v512_v8  ;;  %v781_v24 = vmul.f32 -1.442695, %v550_v9 }
  0x99   : > { %v775_v25 = vmul.f32 -1.442695, %v513_v10  ;;  %v782_v26 = vmul.f32 -1.442695, %v551_v11 }
  0x9a   : > { %942 = vpow2.f32 %v774_v20 }
  0x9b   : > { %944 = vpow2.f32 %v775_v25 }
  0x9c   : > { %946 = vpow2.f32 %v781_v24 }
  0x9d   : > { %948 = vpow2.f32 %v782_v26 }
  0xa4   : > { %v943_v12 = vpop.eup %942 }
  0xa5   : > { %v945_v13 = vpop.eup %944  ;;  %v520_v18 = vadd.f32 1.0, %v943_v12 }
  0xa6   : > { %v947_v19 = vpop.eup %946  ;;  %v521_v28 = vadd.f32 1.0, %v945_v13 }
  0xa7   : > { %v949_v29 = vpop.eup %948  ;;  %950 = vrcp.f32 %v520_v18  ;;  %v558_v30 = vadd.f32 1.0, %v947_v19 }
  0xa8   : > { %952 = vrcp.f32 %v521_v28  ;;  %v559_v31 = vadd.f32 1.0, %v949_v29 }
  0xa9   : > { %954 = vrcp.f32 %v558_v30 }
  0xaa   : > { %956 = vrcp.f32 %v559_v31 }
  0xb1   : > { %v951_v33 = vpop.eup %950 }
  0xb2   : > { %v953_v35 = vpop.eup %952  ;;  %v566_v36 = vmul.f32 %v951_v33, %v565_v32 }
  0xb3   : > { %v955_v37 = vpop.eup %954  ;;  %v567_v38 = vmul.f32 %v953_v35, %v565_v32 }
  0xb4   : > { %v957_v39 = vpop.eup %956  ;;  %v570_v40 = vmul.f32 %v955_v37, %v569_v34 }
  0xb5   : > { %v571_v41 = vmul.f32 %v957_v39, %v569_v34 }
  0xb6   : > { %v572_v43 = vadd.f32 %v570_v40, %v566_v36 }
  0xb7   : > { %v573_v44 = vadd.f32 %v571_v41, %v567_v38 }
  0xb8   : > { %v576_v45 = vadd.f32 %v575_v42, %v572_v43 }
  0xb9   : > { %v577_v21 = vadd.f32 %v575_v42, %v573_v44 }
  0xba   : > { %v786_v22 = vmul.f32 -1.442695, %v576_v45 }
  0xbb   : > { %v787_v14 = vmul.f32 -1.442695, %v577_v21 }
  0xbc   : > { %958 = vpow2.f32 %v786_v22 }
  0xbd   : > { %960 = vpow2.f32 %v787_v14 }
  0xc6   : > { %v959_v15 = vpop.eup %958 }
  0xc7   : > { %v961_v46 = vpop.eup %960  ;;  %v584_v47 = vadd.f32 1.0, %v959_v15 }
  0xc8   : > { %v585_v48 = vadd.f32 1.0, %v961_v46 }
  0xc9   : > { %962 = vrcp.f32 %v584_v47 }
  0xca   : > { %964 = vrcp.f32 %v585_v48 }
  0xd3   : > { %v963_v49 = vpop.eup %962 }
  0xd4   : > { %v965_v50 = vpop.eup %964 }
  0xd5   : > { %v834_v51 = vpack.c.bf16 %v965_v50, %v963_v49 }
  0xd7   : > { %835 = vst [vmem:[%s198_s6] sm:$0xff] %v834_v51  }
  0xd8   : > { %992 = shalt.err (!%p989_p3)
}
  0xd9   : > { %s993_s28 = scalar_lea.hbm %s1410_s17, 128  ;;  %s997_s3 = scalar_lea.hbm %s1458_s2, 256 }
  0xda   : > { %p994_p7 = scmp.ne.s32.totalorder %s1410_s17, %s993_s28  ;;  %p998_p10 = scmp.lt.u32.totalorder %s1410_s17, %s1458_s2 }
  0xdb   : > { %p999_p4 = scmp.lt.u32.totalorder %s997_s3, %s993_s28  ;;  %p1001_p6 = scmp.lt.u32.totalorder %s993_s28, %s1410_s17 }
  0xdc   : > { %p995_p8 = pnand %p994_p7, %p1128_p11 }
  0xdd   : > { %p1000_p5 = por %p999_p4, %p998_p10 }
  0xde   : > { %p996_p9 = pneg %p995_p8 }
  0xdf   : > { %p1002_p13 = por %p1001_p6, %p1000_p5 }
  0xe1   : > { %p1003_p2 = pnand %p1002_p13, %p996_p9 }
  0xe3   : > { %1006 = shalt.err (!%p1003_p2)
}
  0xe4   : > { %s1059_s7 = smov 64   ;;  %s1060_s8 = smov 4  }
  0xe5   : > { %856 = dma.vmem_to_hbm [thread:$0]  (%p1128_p11), %s1412_s24, 128, %s1410_s17, %s601_s25, %s1059_s7, %s1059_s7, %s1060_s8  }
  0xe6 PF: > { %s629_s14 = sand.u32 1, %s1037_s9   ;;  %p863_p0 = pnand %p702_p1, %p1132_p12 }
  0xe7   : > { %s630_s6 = scalar_lea.sflag [#allocation4], %s629_s14 }
  0xe8   : > { %1032 = dma.done.wait (!%p863_p0), %s630_s6, 128  }
  0xe9   : > { %1034 = vsyncadd (!%p863_p0), %s630_s6, 4294967168  ;;  %p16_p3 = scmp.ge.s32.totalorder %s1101_s15, 4   ;;  %s1464_s9 = smov %s1041_s10 }
  0xea   : > { %s1465_s10 = smov %s1045_s11  ;;  %s1466_s11 = smov %s1113_s18 }
  0xeb   : > { %s1467_s12 = smov %s1101_s15  ;;  %18 = sbr.rel (!%p16_p3) target bundleno = 6 (0x6), region = 90 }
  0xf2   :  { %635 = vsyncpa [#allocation3], 1 }
  0xf3   :  { %637 = vsyncpa [#allocation3 + $0x1], 1 }
  0xf4   :  { %638 = vsyncpa [#allocation4], 1 }
  0xf5   :  { %640 = vsyncpa [#allocation4 + $0x1], 1 }
  0xf6   :  { %641 = vsyncpa [#allocation5], 1 }
  0xf7   :  { %643 = vsyncpa [#allocation5 + $0x1], 1 }

</bundles_post_ra>
